<compile_context>
chip_gen: v5e
topology: v5e:2x2
jax: 0.10.0
libtpu: 0.0.40
codegen_flags: <defaults>
</compile_context>

<pallas_src>
import math

import jax
import jax.numpy as jnp
from jax.experimental import pallas as pl
from jax.experimental.pallas import tpu as pltpu


_LANE = 128
_MAX_COLS = 4096
# Target per-block bytes by TPU generation (in + out double-buffered ~ 4x tile).
_TILE_BYTES_BY_GEN = {5: 3 << 20, 6: 6 << 20, 7: 4 << 20}
_DEFAULT_TILE_BYTES = 2 << 20


# ---------------------------------------------------------------------------
# Kernels (single fused mul-add body; forward and inverse share it)
# ---------------------------------------------------------------------------
def _affine_scalar_kernel(a_ref, t_ref, y_ref, o_ref):
    # nd == 1: a / t are (1, 1) f32 SMEM scalars; scalar->vector broadcast is free.
    a = a_ref[0, 0]
    t = t_ref[0, 0]
    o_ref[...] = (a * y_ref[...] + t).astype(o_ref.dtype)


def _affine_row_kernel(a_ref, t_ref, y_ref, o_ref):
    # nd > 1: a / t are (1, cols) f32 VMEM rows (resident), broadcast over sublanes.
    o_ref[...] = (a_ref[...] * y_ref[...] + t_ref[...]).astype(o_ref.dtype)


# ---------------------------------------------------------------------------
# Chip / tiling helpers
# ---------------------------------------------------------------------------
def _tpu_generation():
    try:
        kind = jax.devices()[0].device_kind.lower()
    except Exception:
        return None
    if "v7" in kind:
        return 7
    if "v6" in kind:
        return 6
    if "v5" in kind:
        return 5
    return None


def _sublane_multiple(dtype):
    # 8 for f32, 16 for bf16, 32 for int8/fp8.
    return max(8, 32 // jnp.dtype(dtype).itemsize)


def _choose_tile_rows(rows, cols, itemsize, sub, gen):
    if rows <= sub:
        return rows  # full-extent first dim (always legal)
    target = _TILE_BYTES_BY_GEN.get(gen, _DEFAULT_TILE_BYTES)
    max_rows = max(sub, (target // max(1, cols * itemsize)) // sub * sub)
    tile_r = max(sub, min(rows, max_rows) // sub * sub)
    if gen == 7:
        # Two TensorCores: prefer an even number of grid steps so the
        # ("parallel",) axis splits without a 1-tile imbalance (best effort).
        steps = pl.cdiv(rows, tile_r)
        if steps % 2 == 1:
            cand = max(sub, pl.cdiv(pl.cdiv(rows, steps + 1), sub) * sub)
            if cand < rows:
                tile_r = cand
    return tile_r


# ---------------------------------------------------------------------------
# pallas_call launcher
# ---------------------------------------------------------------------------
def _launch(scale, bias, y2, *, params_in_smem):
    rows, cols = y2.shape
    dtype = y2.dtype
    itemsize = jnp.dtype(dtype).itemsize
    sub = _sublane_multiple(dtype)
    gen = _tpu_generation()
    tile_r = _choose_tile_rows(rows, cols, itemsize, sub, gen)
    grid = (pl.cdiv(rows, tile_r),)

    if params_in_smem:
        kernel = _affine_scalar_kernel
        param_spec = pl.BlockSpec(memory_space=pltpu.MemorySpace.SMEM)
        param_bytes = 2 * 4
    else:
        kernel = _affine_row_kernel
        param_spec = pl.BlockSpec((1, cols), lambda i: (0, 0))
        param_bytes = 2 * cols * 4

    slab_bytes = rows * cols * itemsize
    # v6e has 128 MiB physical VMEM; raise the scoped limit so the larger tiles
    # it gets never trip the default.  v5e/v7x tile targets already fit their
    # default scoped limits (16 MiB / 32 MiB).
    vmem_limit = (64 << 20) if gen == 6 else None

    return pl.pallas_call(
        kernel,
        out_shape=jax.ShapeDtypeStruct((rows, cols), dtype),
        grid_spec=pltpu.PrefetchScalarGridSpec(
            num_scalar_prefetch=0,
            grid=grid,
            in_specs=[
                param_spec,                                      # scale
                param_spec,                                      # bias
                pl.BlockSpec((tile_r, cols), lambda i: (i, 0)),  # y tile
            ],
            out_specs=pl.BlockSpec((tile_r, cols), lambda i: (i, 0)),
        ),
        compiler_params=pltpu.CompilerParams(
            dimension_semantics=("parallel",),
            vmem_limit_bytes=vmem_limit),
        cost_estimate=pl.CostEstimate(
            flops=2 * rows * cols,
            transcendentals=0,
            bytes_accessed=2 * slab_bytes + param_bytes),
    )(scale, bias, y2)


# ---------------------------------------------------------------------------
# Wrappers
# ---------------------------------------------------------------------------
def _apply_scalar(y, scale, bias, orig_shape, dtype, total):
    # Pick the largest power-of-two cols (128..4096) dividing numel so the
    # reshape is a free view (no pad / post-slice HBM passes).
    cols = 0
    for c in (4096, 2048, 1024, 512, 256, 128):
        if total % c == 0:
            cols = c
            break
    if cols == 0:
        # Rare shape (numel not a multiple of 128): main slab via the kernel,
        # tiny (<128 elem) tail via plain XLA.
        flat = y.reshape(-1)
        main = (total // _LANE) * _LANE
        tail = flat[main:]
        tail_out = (scale[0, 0] * tail.astype(jnp.float32)
                    + bias[0, 0]).astype(dtype)
        if main == 0:
            return tail_out.reshape(orig_shape)
        main_out = _apply_scalar(flat[:main], scale, bias, (main,), dtype, main)
        return jnp.concatenate([main_out, tail_out]).reshape(orig_shape)

    rows = total // cols
    out2 = _launch(scale, bias, y.reshape(rows, cols), params_in_smem=True)
    return out2.reshape(orig_shape)


def _affine_apply(y, a, t, inverse):
    orig_shape = y.shape
    dtype = y.dtype
    total = int(y.size)
    nd = int(a.shape[-1])

    a32 = a.reshape(1, nd).astype(jnp.float32)
    t32 = t.reshape(1, nd).astype(jnp.float32)
    if inverse:
        # (x - t)/a == (1/a)*x + (-t/a); precomputed on the tiny params so the
        # per-element kernel is a mul-add (no EUP divide).  a == 0 -> inf/nan,
        # matching the torch semantics of dividing by a clamped-to-zero scale.
        scale = 1.0 / a32
        bias = -t32 * scale
    else:
        scale, bias = a32, t32

    if nd == 1:
        return _apply_scalar(y, scale, bias, orig_shape, dtype, total)

    if orig_shape[-1] != nd:
        raise ValueError(
            f"last dim of input ({orig_shape[-1]}) must equal "
            f"n_dimensions ({nd}) for per-dimension affine")

    # Lane-dense fold: the flattened memory pattern repeats every nd elements,
    # so folding k = lcm(nd,128)/nd logical rows into the lane dim and tiling
    # the params k times is exact.
    cols = nd
    if nd % _LANE != 0:
        folded = (nd * _LANE) // math.gcd(nd, _LANE)  # lcm(nd, 128)
        if folded <= _MAX_COLS and total % folded == 0:
            cols = folded
    k = cols // nd
    rows = total // cols

    scale_row = jnp.tile(scale, (1, k)) if k > 1 else scale
    bias_row = jnp.tile(bias, (1, k)) if k > 1 else bias

    out2 = _launch(scale_row, bias_row, y.reshape(rows, cols),
                   params_in_smem=False)
    return out2.reshape(orig_shape)


# ---------------------------------------------------------------------------
# Module
# ---------------------------------------------------------------------------
class Affine:
    """JAX/Pallas port of the PyTorch Affine transform (positively-constrained scale)."""

    def __init__(self, n_dimensions=1, only_positive_shift=False, learn_t=True,
                 learn_a=True, init_t=0.0, init_a=1.0, eps=1e-12):
        # learn_t / learn_a only set requires_grad in PyTorch (training-time);
        # they do not change the forward pass, so they are stored but unused.
        self.n_dimensions = n_dimensions
        self.only_positive_shift = only_positive_shift
        self.learn_t = learn_t
        self.learn_a = learn_a
        self.eps = eps
        self._a = jnp.full((1, n_dimensions), init_a, dtype=jnp.float32)
        self._t = jnp.full((1, n_dimensions), init_t, dtype=jnp.float32)

    @property
    def a(self):
        # Functional equivalent of `self._a.data.clamp_(min=0.0)`.
        return jnp.maximum(self._a, 0.0)

    @property
    def t(self):
        return jnp.maximum(self._t, 0.0) if self.only_positive_shift else self._t

    def forward(self, y):
        return _affine_apply(y, self.a, self.t, inverse=False)

    __call__ = forward

    def inv(self, x):
        return _affine_apply(x, self.a, self.t, inverse=True)

    def log_abs_det_jacobian(self, y):
        # Param-only (1, n_dims) op: plain XLA — a pallas_call launch costs more
        # than the whole computation and would block fusion with consumers.
        # Matches torch: does NOT broadcast to y's batch shape.
        return jnp.log(jnp.abs(self.a) + self.eps)


# ---------------------------------------------------------------------------
# Demo / self-test
# ---------------------------------------------------------------------------
if __name__ == "__main__":
    key = jax.random.PRNGKey(0)
    k1, k2, k3, k4 = jax.random.split(key, 4)

    # Case 1: scalar affine (n_dimensions=1) on an NCHW-style tensor.
    y = jax.random.normal(k1, (2, 4, 16, 16), dtype=jnp.float32)
    mod = Affine(n_dimensions=1, init_a=1.5, init_t=0.25)

    out = mod(y)
    inv_out = mod.inv(out)
    logdet = mod.log_abs_det_jacobian(y)
    jax.block_until_ready((out, inv_out, logdet))

    ref = mod.a.reshape(()) * y + mod.t.reshape(())
    assert out.shape == y.shape and out.dtype == y.dtype
    assert bool(jnp.allclose(out, ref, rtol=1e-6, atol=1e-6))
    assert bool(jnp.allclose(inv_out, y, rtol=1e-5, atol=1e-5))
    assert logdet.shape == (1, 1)
    assert bool(jnp.allclose(logdet, jnp.log(jnp.abs(mod.a) + mod.eps)))

    # Case 2: per-feature affine (n_dimensions=32) with non-uniform params.
    nd = 32
    y2 = jax.random.normal(k2, (8, nd), dtype=jnp.float32)
    mod2 = Affine(n_dimensions=nd)
    mod2._a = jax.random.uniform(k3, (1, nd), jnp.float32, 0.5, 2.0)
    mod2._t = jax.random.normal(k4, (1, nd), dtype=jnp.float32)

    out2 = mod2(y2)
    inv2 = mod2.inv(out2)
    logdet2 = mod2.log_abs_det_jacobian(y2)
    jax.block_until_ready((out2, inv2, logdet2))

    ref2 = mod2.a * y2 + mod2.t
    assert out2.shape == y2.shape and out2.dtype == y2.dtype
    assert bool(jnp.allclose(out2, ref2, rtol=1e-6, atol=1e-6))
    assert bool(jnp.allclose(inv2, y2, rtol=1e-5, atol=1e-5))
    assert logdet2.shape == (1, nd)
    assert bool(jnp.allclose(logdet2, jnp.log(jnp.abs(mod2.a) + mod2.eps)))

    print("KERNEL_OK")
</pallas_src>

<mosaic_0001>
module attributes {stable_mosaic.version = 11 : i64} {
  func.func @_affine_scalar_kernel(%arg0: i32, %arg1: memref<1x1xf32, #tpu.memory_space<smem>>, %arg2: memref<1x1xf32, #tpu.memory_space<smem>>, %arg3: memref<1x2048xf32, #tpu.memory_space<vmem>>, %arg4: memref<1x2048xf32, #tpu.memory_space<vmem>>) attributes {dimension_semantics = [#tpu.dimension_semantics<parallel>], iteration_bounds = array<i64: 1>, scalar_prefetch = 0 : i64, scratch_operands = 0 : i64, tpu.core_type = #tpu.core_type<tc>, window_params = [{transform_indices = @transform_0, window_bounds = array<i64: 1, 1>}, {transform_indices = @transform_1, window_bounds = array<i64: 1, 1>}, {transform_indices = @transform_2, window_bounds = array<i64: 1, 2048>}, {transform_indices = @transform_3, window_bounds = array<i64: 1, 2048>}]} {
    %c0 = arith.constant 0 : index
    %c0_0 = arith.constant 0 : index
    %0 = memref.load %arg1[%c0, %c0_0] : memref<1x1xf32, #tpu.memory_space<smem>>
    %c0_1 = arith.constant 0 : index
    %c0_2 = arith.constant 0 : index
    %1 = memref.load %arg2[%c0_1, %c0_2] : memref<1x1xf32, #tpu.memory_space<smem>>
    %c0_3 = arith.constant 0 : index
    %c0_4 = arith.constant 0 : index
    %2 = vector.load %arg3[%c0_3, %c0_4] : memref<1x2048xf32, #tpu.memory_space<vmem>>, vector<1x2048xf32>
    %3 = vector.broadcast %0 : f32 to vector<1x2048xf32>
    %4 = arith.mulf %3, %2 : vector<1x2048xf32>
    %5 = vector.broadcast %1 : f32 to vector<1x2048xf32>
    %6 = arith.addf %4, %5 : vector<1x2048xf32>
    %c0_5 = arith.constant 0 : index
    %c0_6 = arith.constant 0 : index
    %7 = vector.load %arg4[%c0_5, %c0_6] : memref<1x2048xf32, #tpu.memory_space<vmem>>, vector<1x2048xf32>
    tpu.vector_store %arg4[%c0_5, %c0_6], %6 {strides = array<i32>} : memref<1x2048xf32, #tpu.memory_space<vmem>>, vector<1x2048xf32>,
    return
  }
  func.func @transform_0(%arg0: i32) -> (i32, i32) {
    %c0_i32 = arith.constant 0 : i32
    %c0_i32_0 = arith.constant 0 : i32
    %c0_i32_1 = arith.constant 0 : i32
    return %c0_i32, %c0_i32_0 : i32, i32
  }
  func.func @transform_1(%arg0: i32) -> (i32, i32) {
    %c0_i32 = arith.constant 0 : i32
    %c0_i32_0 = arith.constant 0 : i32
    %c0_i32_1 = arith.constant 0 : i32
    return %c0_i32, %c0_i32_0 : i32, i32
  }
  func.func @transform_2(%arg0: i32) -> (i32, i32) {
    %c0_i32 = arith.constant 0 : i32
    %c0_i32_0 = arith.constant 0 : i32
    return %arg0, %c0_i32 : i32, i32
  }
  func.func @transform_3(%arg0: i32) -> (i32, i32) {
    %c0_i32 = arith.constant 0 : i32
    %c0_i32_0 = arith.constant 0 : i32
    return %arg0, %c0_i32 : i32, i32
  }
}

</mosaic_0001>

<bundles_post_ra>
// kernel: tpu_custom_call.1
= control target key start
LH: loop header
LB: loop body
LE: loop exit
PB: predicated region body
PF: predicated region fallthrough
CT: control target
= control target key end

     0   :  { %10 = vsyncpa [#allocation5], 0  ;;  %s148_s0 = inlined_call_operand.<no memory space> [shape: f32[1,1], index: 0, kind: input, shape index: {}]   ;;  %s149_s1 = inlined_call_operand.<no memory space> [shape: f32[1,1], index: 1, kind: input, shape index: {}]   ;;  %s150_s2 = inlined_call_operand.hbm [shape: f32[1,2048], index: 2, kind: input, shape index: {}]   ;;  %s151_s3 = inlined_call_operand.hbm [shape: f32[1,2048], index: 3, kind: output, shape index: {}]  }
   0x1   :  { %11 = vsyncpa [#allocation6], 0  ;;  %s21_s14 = sshll.u32 %s150_s2, 4  ;;  %s114_s15 = smov [#allocation4]   ;;  %s22_s14 = int_to_ptr.hbm [resolvable:$true] %s21_s14 }
   0x2   :  { %s23_s16 = sshll.u32 %s114_s15, 4  ;;  %s24_s16 = int_to_ptr.vmem [resolvable:$true] %s23_s16 }
   0x3   :  { %26 = dma.hbm_to_vmem [thread:$0]  %s22_s14, 256, %s24_s16, [#allocation5]  }
   0x4   :  { %110 = dma.done.wait [#allocation5], 256  }
   0x5   :  { %111 = vsyncadd [#allocation5], 4294967040  ;;  %v35_v0 = vstv %s148_s0  ;;  %v33_v1 = vld [vmem:[#allocation4] sm:$0xff]  ;;  %v38_v2 = vstv %s149_s1  ;;  %v34_v3 = vld [vmem:[#allocation4 + $0x8] sm:$0xff]  ;;  %s115_s2 = smov [#allocation7]   ;;  %s50_s24 = sshll.u32 %s151_s3, 4  ;;  %s51_s24 = int_to_ptr.hbm [resolvable:$true] %s50_s24 }
   0x6   :  { %v36_v4 = vmul.f32 %v35_v0, %v33_v1  ;;  %v37_v5 = vmul.f32 %v35_v0, %v34_v3  ;;  %s48_s21 = sshll.u32 %s115_s2, 4  ;;  %s49_s21 = int_to_ptr.vmem [resolvable:$true] %s48_s21 }
   0x8   :  { %v39_v6 = vadd.f32 %v38_v2, %v36_v4  ;;  %v40_v7 = vadd.f32 %v38_v2, %v37_v5 }
   0xa   :  { %41 = vst [vmem:[#allocation7] sm:$0xff] %v39_v6 }
   0xb   :  { %42 = vst [vmem:[#allocation7 + $0x8] sm:$0xff] %v40_v7 }
   0xc   :  { %53 = dma.vmem_to_hbm [thread:$0]  %s49_s21, 256, %s51_s24, [#allocation6]  }
   0xd   :  { %112 = dma.done.wait [#allocation6], 256  }
   0xe   :  { %113 = vsyncadd [#allocation6], 4294967040 }
   0xf   :  { %58 = vsyncpa [#allocation5], 1 }
  0x10   :  { %59 = vsyncpa [#allocation6], 1 }

</bundles_post_ra>
